<compile_context>
chip_gen: v5e
topology: v5e:2x2
jax: 0.10.0
libtpu: 0.0.40
codegen_flags: <defaults>
</compile_context>

<pallas_src>
import jax
import jax.numpy as jnp
from jax import lax
from jax.experimental import pallas as pl
from jax.experimental.pallas import tpu as pltpu

# ITU-R 601-2 luma weights (same as torchvision transforms.Grayscale).
_RW, _GW, _BW = 0.2989, 0.5870, 0.1140

_LANE = 128
_SUBLANE = 8
_MAX_ROWS_PER_BLOCK = 2048          # 2048 x 128 f32 x 3 channels = 3 MiB per input block


def _round_up(x, m):
    return ((x + m - 1) // m) * m


def _make_gray_mse_kernel(T, rows_p, num_chunks, half, needs_mask):
    """Build the kernel with all tiling parameters baked in statically."""

    def kernel(src_ref, tgt_ref, out_ref):
        # src_ref / tgt_ref: (1, 3, T, 128) block of one image chunk (native dtype).
        # out_ref: (1, 1, 8, 128) per-(batch, half) partial-sum accumulator,
        #          resident across the chunk (reduction) grid axis.
        h = pl.program_id(1)            # which parallel half of the chunk axis
        k = pl.program_id(2)            # chunk index within the half

        @pl.when(k == 0)
        def _init():
            out_ref[...] = jnp.zeros_like(out_ref)

        # Channel-sliced loads: only (T,128)-sized live f32 values. Difference
        # first, then one weighted combine and one square per pixel.
        d0 = src_ref[0, 0].astype(jnp.float32) - tgt_ref[0, 0].astype(jnp.float32)
        d1 = src_ref[0, 1].astype(jnp.float32) - tgt_ref[0, 1].astype(jnp.float32)
        d2 = src_ref[0, 2].astype(jnp.float32) - tgt_ref[0, 2].astype(jnp.float32)
        g = _RW * d0 + _GW * d1 + _BW * d2            # (T, 128)
        sq = g * g                                    # (T, 128)

        def accumulate(vals):
            # Lane/sublane-parallel fold of T rows onto an (8,128) vreg-shaped
            # accumulator — pure VALU adds, no cross-lane XLU work per step.
            partial = jnp.sum(vals.reshape(T // _SUBLANE, _SUBLANE, _LANE), axis=0)
            out_ref[...] += partial[None, None]

        if needs_mask:
            c = h * half + k                          # global chunk index
            last = num_chunks - 1

            @pl.when(c >= last)                       # ragged tail / overflow chunk only
            def _tail():
                valid = jnp.clip(rows_p - c * T, 0, T)        # 0 for overflow chunks
                row_idx = lax.broadcasted_iota(jnp.int32, (T, _LANE), 0)
                accumulate(jnp.where(row_idx < valid, sq, 0.0))

            @pl.when(c < last)                        # full chunks: no masking cost
            def _full():
                accumulate(sq)
        else:
            accumulate(sq)

    return kernel


def grayscale_loss(src, target, *, max_rows_per_block=_MAX_ROWS_PER_BLOCK):
    """src, target: (N, 3, H, W) arrays (NCHW, any float dtype). Scalar MSE of grays."""
    assert src.shape == target.shape
    N, C, H, W = src.shape
    assert C == 3, "Grayscale transform expects 3 input channels"
    HW = H * W
    itemsize = jnp.dtype(src.dtype).itemsize

    # ---- tiling ------------------------------------------------------------
    rows = pl.cdiv(HW, _LANE)                   # ceil(HW / 128)
    rows_p = _round_up(rows, _SUBLANE)          # pad rows only to a multiple of 8
    HW_p = rows_p * _LANE
    T = min(_round_up(max_rows_per_block, _SUBLANE), rows_p)   # multiple of 8, <= rows_p
    num_chunks = pl.cdiv(rows_p, T)             # no round-up-to-T padding
    P = 2 if num_chunks >= 2 else 1             # keep both v7x TensorCores busy at N==1
    half = pl.cdiv(num_chunks, P)
    has_overflow = P * half != num_chunks       # odd chunk count split across halves
    needs_mask = (rows_p % T != 0) or has_overflow

    # ---- layout (reshapes are metadata-only when no pad is needed) ----------
    src_f = src.reshape(N, C, HW)
    tgt_f = target.reshape(N, C, HW)
    if HW_p != HW:
        # Only triggers when H*W is not a multiple of 1024 (= 8*128). Zero pad on
        # BOTH inputs -> diff is zero there -> contributes 0 to the sum.
        pad = HW_p - HW
        src_f = jnp.pad(src_f, ((0, 0), (0, 0), (0, pad)))
        tgt_f = jnp.pad(tgt_f, ((0, 0), (0, 0), (0, pad)))
    src_r = src_f.reshape(N, C, rows_p, _LANE)
    tgt_r = tgt_f.reshape(N, C, rows_p, _LANE)

    # ---- index maps ----------------------------------------------------------
    if has_overflow:
        # Clamp the block index for the single overflow grid step; the kernel
        # masks its contribution to exactly zero.
        def in_map(i, h, k):
            return (i, 0, jnp.minimum(h * half + k, num_chunks - 1), 0)
    else:
        def in_map(i, h, k):
            return (i, 0, h * half + k, 0)

    def out_map(i, h, k):
        return (i, h, 0, 0)

    kernel = _make_gray_mse_kernel(T, rows_p, num_chunks, half, needs_mask)

    # ---- VMEM budget: 2 inputs x 2 pipeline buffers + temporaries + slack ----
    in_block_bytes = C * T * _LANE * itemsize
    vmem_limit = int(min(4 * in_block_bytes + (24 << 20), 56 << 20))

    cost = pl.CostEstimate(
        flops=10 * N * HW,                                        # ~10 flops / pixel
        bytes_accessed=2 * N * C * HW_p * itemsize + N * P * _SUBLANE * _LANE * 4,
        transcendentals=0,
    )

    partial_sums = pl.pallas_call(
        kernel,
        out_shape=jax.ShapeDtypeStruct((N, P, _SUBLANE, _LANE), jnp.float32),
        grid_spec=pltpu.PrefetchScalarGridSpec(
            num_scalar_prefetch=0,
            grid=(N, P, half),                     # reduction (chunk) axis last
            in_specs=[
                pl.BlockSpec((1, C, T, _LANE), in_map),
                pl.BlockSpec((1, C, T, _LANE), in_map),
            ],
            out_specs=pl.BlockSpec((1, 1, _SUBLANE, _LANE), out_map),
        ),
        compiler_params=pltpu.CompilerParams(
            dimension_semantics=("parallel", "parallel", "arbitrary"),
            vmem_limit_bytes=vmem_limit,
        ),
        cost_estimate=cost,
    )(src_r, tgt_r)

    # Final tiny cross-lane / cross-batch reduction + mean (runs once, in XLA).
    inv_count = jnp.float32(1.0 / float(N * H * W))
    return jnp.sum(partial_sums) * inv_count


def _reference_grayscale_loss(src, target):
    w = jnp.array([_RW, _GW, _BW], dtype=jnp.float32).reshape(1, 3, 1, 1)
    gs = jnp.sum(src.astype(jnp.float32) * w, axis=1, keepdims=True)
    gt = jnp.sum(target.astype(jnp.float32) * w, axis=1, keepdims=True)
    return jnp.mean((gs - gt) ** 2)


if __name__ == "__main__":
    key = jax.random.PRNGKey(0)
    k1, k2, k3, k4 = jax.random.split(key, 4)

    # Primary small check (matches the module's expected NCHW input).
    N, C, H, W = 2, 3, 16, 16
    src = jax.random.uniform(k1, (N, C, H, W), dtype=jnp.float32)
    target = jax.random.uniform(k2, (N, C, H, W), dtype=jnp.float32)
    loss = grayscale_loss(src, target)
    jax.block_until_ready(loss)
    ref = _reference_grayscale_loss(src, target)
    assert jnp.allclose(loss, ref, rtol=1e-4, atol=1e-6), (loss, ref)

    # Exercise the multi-chunk + ragged-tail masking path (small T override).
    N2, H2, W2 = 2, 3, 48 * 48 // 48  # keep it tiny: reshaped below to (2,3,48,48)
    src2 = jax.random.uniform(k3, (2, 3, 48, 48), dtype=jnp.float32)
    target2 = jax.random.uniform(k4, (2, 3, 48, 48), dtype=jnp.float32)
    loss2 = grayscale_loss(src2, target2, max_rows_per_block=16)   # tail-mask path
    loss3 = grayscale_loss(src2, target2, max_rows_per_block=8)    # odd-chunk / overflow path
    jax.block_until_ready((loss2, loss3))
    ref2 = _reference_grayscale_loss(src2, target2)
    assert jnp.allclose(loss2, ref2, rtol=1e-4, atol=1e-6), (loss2, ref2)
    assert jnp.allclose(loss3, ref2, rtol=1e-4, atol=1e-6), (loss3, ref2)

    # Native-dtype (bf16) inputs: kernel upcasts in-register, halving HBM traffic.
    src_bf = src.astype(jnp.bfloat16)
    tgt_bf = target.astype(jnp.bfloat16)
    loss_bf = grayscale_loss(src_bf, tgt_bf)
    jax.block_until_ready(loss_bf)
    ref_bf = _reference_grayscale_loss(src_bf, tgt_bf)
    assert jnp.allclose(loss_bf, ref_bf, rtol=1e-4, atol=1e-6), (loss_bf, ref_bf)

    print("KERNEL_OK")
</pallas_src>

<mosaic_0001>
module attributes {stable_mosaic.version = 11 : i64} {
  func.func @kernel(%arg0: i32, %arg1: i32, %arg2: i32, %arg3: memref<1x3x8x128xf32, #tpu.memory_space<vmem>>, %arg4: memref<1x3x8x128xf32, #tpu.memory_space<vmem>>, %arg5: memref<1x1x8x128xf32, #tpu.memory_space<vmem>>) attributes {dimension_semantics = [#tpu.dimension_semantics<parallel>, #tpu.dimension_semantics<parallel>, #tpu.dimension_semantics<arbitrary>], iteration_bounds = array<i64: 2, 1, 1>, scalar_prefetch = 0 : i64, scratch_operands = 0 : i64, tpu.core_type = #tpu.core_type<tc>, window_params = [{transform_indices = @transform_0, window_bounds = array<i64: 1, 3, 8, 128>}, {transform_indices = @transform_1, window_bounds = array<i64: 1, 3, 8, 128>}, {transform_indices = @transform_2, window_bounds = array<i64: 1, 1, 8, 128>}]} {
    %c0_i32 = arith.constant 0 : i32
    %0 = arith.cmpi eq, %arg2, %c0_i32 : i32
    %1 = arith.extui %0 : i1 to i32
    %c0_i32_0 = arith.constant 0 : i32
    %2 = arith.cmpi ne, %1, %c0_i32_0 : i32
    scf.if %2 {
      %cst_33 = arith.constant 0.000000e+00 : f32
      %33 = vector.broadcast %cst_33 : f32 to vector<1x1x8x128xf32>
      %c0_34 = arith.constant 0 : index
      %c0_35 = arith.constant 0 : index
      %c0_36 = arith.constant 0 : index
      %c0_37 = arith.constant 0 : index
      %34 = vector.load %arg5[%c0_34, %c0_35, %c0_36, %c0_37] : memref<1x1x8x128xf32, #tpu.memory_space<vmem>>, vector<1x1x8x128xf32>
      tpu.vector_store %arg5[%c0_34, %c0_35, %c0_36, %c0_37], %33 {strides = array<i32>} : memref<1x1x8x128xf32, #tpu.memory_space<vmem>>, vector<1x1x8x128xf32>,
    } else {
    }
    %c0 = arith.constant 0 : index
    %c0_1 = arith.constant 0 : index
    %c0_2 = arith.constant 0 : index
    %c0_3 = arith.constant 0 : index
    %3 = vector.load %arg3[%c0, %c0_1, %c0_2, %c0_3] : memref<1x3x8x128xf32, #tpu.memory_space<vmem>>, vector<1x1x8x128xf32>
    %4 = vector.shape_cast %3 : vector<1x1x8x128xf32> to vector<8x128xf32>
    %c0_4 = arith.constant 0 : index
    %c0_5 = arith.constant 0 : index
    %c0_6 = arith.constant 0 : index
    %c0_7 = arith.constant 0 : index
    %5 = vector.load %arg4[%c0_4, %c0_5, %c0_6, %c0_7] : memref<1x3x8x128xf32, #tpu.memory_space<vmem>>, vector<1x1x8x128xf32>
    %6 = vector.shape_cast %5 : vector<1x1x8x128xf32> to vector<8x128xf32>
    %7 = arith.subf %4, %6 : vector<8x128xf32>
    %c0_8 = arith.constant 0 : index
    %c1 = arith.constant 1 : index
    %c0_9 = arith.constant 0 : index
    %c0_10 = arith.constant 0 : index
    %8 = vector.load %arg3[%c0_8, %c1, %c0_9, %c0_10] : memref<1x3x8x128xf32, #tpu.memory_space<vmem>>, vector<1x1x8x128xf32>
    %9 = vector.shape_cast %8 : vector<1x1x8x128xf32> to vector<8x128xf32>
    %c0_11 = arith.constant 0 : index
    %c1_12 = arith.constant 1 : index
    %c0_13 = arith.constant 0 : index
    %c0_14 = arith.constant 0 : index
    %10 = vector.load %arg4[%c0_11, %c1_12, %c0_13, %c0_14] : memref<1x3x8x128xf32, #tpu.memory_space<vmem>>, vector<1x1x8x128xf32>
    %11 = vector.shape_cast %10 : vector<1x1x8x128xf32> to vector<8x128xf32>
    %12 = arith.subf %9, %11 : vector<8x128xf32>
    %c0_15 = arith.constant 0 : index
    %c2 = arith.constant 2 : index
    %c0_16 = arith.constant 0 : index
    %c0_17 = arith.constant 0 : index
    %13 = vector.load %arg3[%c0_15, %c2, %c0_16, %c0_17] : memref<1x3x8x128xf32, #tpu.memory_space<vmem>>, vector<1x1x8x128xf32>
    %14 = vector.shape_cast %13 : vector<1x1x8x128xf32> to vector<8x128xf32>
    %c0_18 = arith.constant 0 : index
    %c2_19 = arith.constant 2 : index
    %c0_20 = arith.constant 0 : index
    %c0_21 = arith.constant 0 : index
    %15 = vector.load %arg4[%c0_18, %c2_19, %c0_20, %c0_21] : memref<1x3x8x128xf32, #tpu.memory_space<vmem>>, vector<1x1x8x128xf32>
    %16 = vector.shape_cast %15 : vector<1x1x8x128xf32> to vector<8x128xf32>
    %17 = arith.subf %14, %16 : vector<8x128xf32>
    %cst = arith.constant 2.989000e-01 : f32
    %18 = vector.broadcast %cst : f32 to vector<8x128xf32>
    %19 = arith.mulf %18, %7 : vector<8x128xf32>
    %cst_22 = arith.constant 5.870000e-01 : f32
    %20 = vector.broadcast %cst_22 : f32 to vector<8x128xf32>
    %21 = arith.mulf %20, %12 : vector<8x128xf32>
    %22 = arith.addf %19, %21 : vector<8x128xf32>
    %cst_23 = arith.constant 1.140000e-01 : f32
    %23 = vector.broadcast %cst_23 : f32 to vector<8x128xf32>
    %24 = arith.mulf %23, %17 : vector<8x128xf32>
    %25 = arith.addf %22, %24 : vector<8x128xf32>
    %26 = arith.mulf %25, %25 : vector<8x128xf32>
    %27 = vector.shape_cast %26 : vector<8x128xf32> to vector<1x8x128xf32>
    %cst_24 = arith.constant dense<0.000000e+00> : vector<8x128xf32>
    %28 = vector.multi_reduction <add>, %27, %cst_24 [0] : vector<1x8x128xf32> to vector<8x128xf32>
    %c0_25 = arith.constant 0 : index
    %c0_26 = arith.constant 0 : index
    %c0_27 = arith.constant 0 : index
    %c0_28 = arith.constant 0 : index
    %29 = vector.load %arg5[%c0_25, %c0_26, %c0_27, %c0_28] : memref<1x1x8x128xf32, #tpu.memory_space<vmem>>, vector<1x1x8x128xf32>
    %30 = vector.shape_cast %28 : vector<8x128xf32> to vector<1x1x8x128xf32>
    %31 = arith.addf %29, %30 : vector<1x1x8x128xf32>
    %c0_29 = arith.constant 0 : index
    %c0_30 = arith.constant 0 : index
    %c0_31 = arith.constant 0 : index
    %c0_32 = arith.constant 0 : index
    %32 = vector.load %arg5[%c0_29, %c0_30, %c0_31, %c0_32] : memref<1x1x8x128xf32, #tpu.memory_space<vmem>>, vector<1x1x8x128xf32>
    tpu.vector_store %arg5[%c0_29, %c0_30, %c0_31, %c0_32], %31 {strides = array<i32>} : memref<1x1x8x128xf32, #tpu.memory_space<vmem>>, vector<1x1x8x128xf32>,
    return
  }
  func.func @transform_0(%arg0: i32, %arg1: i32, %arg2: i32) -> (i32, i32, i32, i32) {
    %c1_i32 = arith.constant 1 : i32
    %0 = arith.muli %arg1, %c1_i32 : i32
    %1 = arith.addi %0, %arg2 : i32
    %c0_i32 = arith.constant 0 : i32
    %c0_i32_0 = arith.constant 0 : i32
    %c0_i32_1 = arith.constant 0 : i32
    return %arg0, %c0_i32, %1, %c0_i32_0 : i32, i32, i32, i32
  }
  func.func @transform_1(%arg0: i32, %arg1: i32, %arg2: i32) -> (i32, i32, i32, i32) {
    %c1_i32 = arith.constant 1 : i32
    %0 = arith.muli %arg1, %c1_i32 : i32
    %1 = arith.addi %0, %arg2 : i32
    %c0_i32 = arith.constant 0 : i32
    %c0_i32_0 = arith.constant 0 : i32
    %c0_i32_1 = arith.constant 0 : i32
    return %arg0, %c0_i32, %1, %c0_i32_0 : i32, i32, i32, i32
  }
  func.func @transform_2(%arg0: i32, %arg1: i32, %arg2: i32) -> (i32, i32, i32, i32) {
    %c0_i32 = arith.constant 0 : i32
    %c0_i32_0 = arith.constant 0 : i32
    %c0_i32_1 = arith.constant 0 : i32
    return %arg0, %arg1, %c0_i32, %c0_i32_0 : i32, i32, i32, i32
  }
}

</mosaic_0001>

<bundles_post_ra>
// kernel: tpu_custom_call.1
= control target key start
LH: loop header
LB: loop body
LE: loop exit
PB: predicated region body
PF: predicated region fallthrough
CT: control target
= control target key end

     0   :  { %7 = vsyncpa [#allocation3], 0  ;;  %s795_s0 = inlined_call_operand.hbm [shape: f32[2,3,8,128], index: 0, kind: input, shape index: {}]   ;;  %s796_s1 = inlined_call_operand.hbm [shape: f32[2,3,8,128], index: 1, kind: input, shape index: {}]   ;;  %s797_s2 = inlined_call_operand.hbm [shape: f32[2,1,8,128], index: 2, kind: output, shape index: {}]  }
   0x1   :  { %9 = vsyncpa [#allocation3 + $0x1], 0 }
   0x2   :  { %10 = vsyncpa [#allocation6], 0 }
   0x3   :  { %12 = vsyncpa [#allocation6 + $0x1], 0 }
   0x4   :  { %13 = vsyncpa [#allocation4], 0 }
   0x5   :  { %15 = vsyncpa [#allocation4 + $0x1], 0  ;;  %s653_s9 = smov 0   ;;  %s655_s10 = smov 0  }
   0x6   :  { %s657_s11 = smov 0   ;;  %s659_s12 = smov 0  }
   0x7   :  { %s661_s13 = smov 0   ;;  %s663_s14 = smov 0  }
   0x8 LB: > { %s397_s15 = sadd.s32 4294967295, %s634_s14   ;;  %s398_s16 = sadd.s32 4294967294, %s634_s14   ;;  %s634_s14 = sphi %s663_s14, %s21_s14   ;;  %s630_s13 = sphi %s661_s13, %s807_s13   ;;  %s626_s12 = sphi %s659_s12, %s806_s12   ;;  %s622_s11 = sphi %s657_s11, %s805_s11   ;;  %s618_s10 = sphi %s655_s10, %s804_s10   ;;  %s614_s9 = sphi %s653_s9, %s803_s9  }
   0x9   : > { %s40_s17 = sadd.s32 1, %s630_s13  ;;  %s51_s18 = sadd.s32 1, %s622_s11 }
   0xa   : > { %p42_p0 = scmp.ge.s32.totalorder %s40_s17, 2  ;;  %p58_p1 = scmp.ne.s32.totalorder %s622_s11, %s618_s10 }
   0xb   : > { %p59_p2 = scmp.eq.s32.totalorder %s634_s14, 0  ;;  %p64_p3 = scmp.ne.s32.totalorder %s618_s10, %s614_s9 }
   0xc   : > { %s809_s17 = smov (%p42_p0, %s40_s17), 0  ;;  %p65_p5 = scmp.eq.s32.totalorder %s397_s15, 0 }
   0xd   : > { %p694_p4 = por %p59_p2, %p58_p1  ;;  %s46_s20 = ssub.s32 %s630_s13, %s809_s17 }
   0xe   : > { %p120_p6 = scmp.eq.s32.totalorder %s397_s15, 1  ;;  %p49_p7 = scmp.eq.s32.totalorder %s46_s20, 0 }
   0xf   : > { %p700_p8 = por %p65_p5, %p64_p3  ;;  %p126_p10 = scmp.eq.s32.totalorder %s398_s16, 1 }
  0x10   : > { %p704_p9 = por %p120_p6, %p58_p1  ;;  %p400_p12 = scmp.ge.s32.totalorder %s634_s14, 2 }
  0x11   : > { %s709_s23 = scalar_select %p49_p7, %s622_s11, %s51_s18  }
  0x12   : > { %p711_p11 = por %p126_p10, %p64_p3  ;;  %p435_p13 = scmp.lt.s32.totalorder %s634_s14, 2 }
  0x13   : > { %s718_s25 = sand.u32 1, %s622_s11   ;;  %s414_s27 = smul.u32 24, %s630_s13 }
  0x14   : > { %s413_s26 = smul.u32 24, %s718_s25  ;;  %p724_p0 = pnand %p435_p13, %p694_p4 }
  0x15   : > { %s157_s3 = scalar_lea.hbm %s795_s0, %s414_s27  ;;  %p403_p1 = scmp.ge.s32.totalorder %s634_s14, 1 }
  0x16   : > { %s150_s4 = scalar_lea.vmem [#allocation2], %s413_s26  ;;  %s158_s6 = sshll.u32 %s157_s3, 4  ;;  %s159_s6 = int_to_ptr.hbm [resolvable:$true] %s158_s6 }
  0x17   : > { %s160_s5 = sshll.u32 %s150_s4, 4  ;;  %s147_s7 = scalar_lea.sflag [#allocation3], %s718_s25  ;;  %s161_s5 = int_to_ptr.vmem [resolvable:$true] %s160_s5 }
  0x18   : > { %s636_s8 = smov 128   ;;  %s637_s15 = smov 8  }
  0x19   : > { %427 = dma.hbm_to_vmem [thread:$0]  (!%p724_p0), %s159_s6, 384, %s161_s5, %s147_s7, %s636_s8, %s636_s8, %s637_s15  }
  0x1a   : > { %p192_p2 = scmp.lt.s32.totalorder %s634_s14, 3  ;;  %s181_s19 = scalar_lea.hbm %s796_s1, %s414_s27 }
  0x1b   : > { %s182_s20 = sshll.u32 %s181_s19, 4  ;;  %s174_s29 = scalar_lea.vmem [#allocation5], %s413_s26  ;;  %s183_s20 = int_to_ptr.hbm [resolvable:$true] %s182_s20 }
  0x1c   : > { %p193_p3 = pnand %p403_p1, %p192_p2  ;;  %s184_s30 = sshll.u32 %s174_s29, 4  ;;  %s185_s30 = int_to_ptr.vmem [resolvable:$true] %s184_s30 }
  0x1d   : > { %s171_s3 = scalar_lea.sflag [#allocation6], %s718_s25  ;;  %s743_s4 = sand.u32 (!%p193_p3), 1, %s618_s10  }
  0x1e   : > { %430 = dma.hbm_to_vmem [thread:$0]  (!%p724_p0), %s183_s20, 384, %s185_s30, %s171_s3, %s636_s8, %s636_s8, %s637_s15  }
  0x1f   : > { %196 = sbr.rel (%p193_p3) target bundleno = 54 (0x36), region = 28  ;;  %s199_s6 = scalar_lea.sflag (!%p193_p3), [#allocation3], %s743_s4 }
  0x20   : > { %s417_s5 = smul.u32 (!%p193_p3), 24, %s743_s4 }
  0x22   : > { %s202_s7 = scalar_lea.vmem (!%p193_p3), [#allocation2], %s417_s5 }
  0x24   : > { %601 = dma.done.wait (%p700_p8), %s199_s6, 384  }
  0x25   : > { %603 = vsyncadd (%p700_p8), %s199_s6, 4294966912  ;;  %s209_s25 = scalar_lea.sflag [#allocation6], %s743_s4  ;;  %s212_s26 = scalar_lea.vmem [#allocation5], %s417_s5 }
  0x26   : > { %605 = dma.done.wait (%p700_p8), %s209_s25, 384  }
  0x27   : > { %607 = vsyncadd (%p700_p8), %s209_s25, 4294966912  ;;  %v246_v0 = vld [vmem:[%s202_s7] sm:$0xff]  ;;  %v247_v1 = vld [vmem:[%s212_s26] sm:$0xff]  ;;  %s404_s27 = sshll.u32 %s743_s4, 3  ;;  %s410_s28 = sshll.u32 %s626_s12, 3 }
  0x28   : > { %v405_v2 = vld [vmem:[%s202_s7 + $0x8] sm:$0xff]  ;;  %v248_v3 = vsub.f32 %v246_v0, %v247_v1  ;;  %v406_v4 = vld [vmem:[%s212_s26 + $0x8] sm:$0xff]  ;;  %v407_v5 = vld [vmem:[%s202_s7 + $0x10] sm:$0xff]  ;;  %s281_s15 = scalar_lea.hbm %s797_s2, %s410_s28  ;;  %s238_s16 = scalar_lea.vmem [#allocation7], %s404_s27 }
  0x29   : > { %v408_v6 = vld [vmem:[%s212_s26 + $0x10] sm:$0xff]  ;;  %v253_v7 = vsub.f32 %v405_v2, %v406_v4  ;;  %s283_s18 = sshll.u32 %s238_s16, 4  ;;  %s285_s19 = sshll.u32 %s281_s15, 4  ;;  %s284_s18 = int_to_ptr.vmem [resolvable:$true] %s283_s18  ;;  %s286_s19 = int_to_ptr.hbm [resolvable:$true] %s285_s19 }
  0x2a   : > { %v258_v8 = vsub.f32 %v407_v5, %v408_v6  ;;  %v259_v9 = vmul.f32 0.2989, %v248_v3  ;;  %s270_s20 = scalar_lea.sflag [#allocation4], %s743_s4  ;;  %s562_s29 = sshra.s32 %s286_s19, 4  ;;  %s563_s29 = int_to_ptr.hbm [resolvable:$true] %s562_s29 }
  0x2b   : > { %v260_v10 = vmul.f32 0.587, %v253_v7  ;;  %s564_s12 = scalar_lea.hbm %s563_s29, 8  ;;  %s568_s5 = scalar_lea.hbm %s797_s2, 16 }
  0x2c   : > { %v262_v11 = vmul.f32 0.114, %v258_v8  ;;  %p565_p4 = scmp.ne.s32.totalorder %s563_s29, %s564_s12  ;;  %p569_p7 = scmp.lt.s32.totalorder %s563_s29, %s797_s2 }
  0x2d   : > { %v261_v12 = vadd.f32 %v260_v10, %v259_v9  ;;  %p570_p8 = scmp.lt.s32.totalorder %s568_s5, %s564_s12 }
  0x2e   : > { %p566_p5 = pnand %p565_p4, %p704_p9 }
  0x2f   : > { %v263_v13 = vadd.f32 %v262_v11, %v261_v12  ;;  %p571_p10 = por %p570_p8, %p569_p7 }
  0x30   : > { %p567_p6 = pneg %p566_p5 }
  0x31   : > { %v264_v14 = vmul.f32 %v263_v13, %v263_v13 }
  0x32   : > { %p572_p13 = pnand %p571_p10, %p567_p6 }
  0x33   : > { %268 = vst [vmem:[%s238_s16] sm:$0xff] %v264_v14 }
  0x34   : > { %575 = shalt.err (!%p572_p13)
}
  0x35   : > { %422 = dma.vmem_to_hbm [thread:$0]  (%p704_p9), %s284_s18, 128, %s286_s19, %s270_s20  }
  0x36 PF: > { %s297_s4 = sand.u32 1, %s614_s9   ;;  %p432_p0 = pnand %p400_p12, %p711_p11 }
  0x37   : > { %s298_s25 = scalar_lea.sflag [#allocation4], %s297_s4 }
  0x38   : > { %p433_p1 = pneg %p432_p0 }
  0x3a   : > { %609 = dma.done.wait (%p433_p1), %s298_s25, 128  }
  0x3b   : > { %611 = vsyncadd (%p433_p1), %s298_s25, 4294967168  ;;  %s21_s14 = sadd.s32 1, %s634_s14   ;;  %s803_s9 = smov %s618_s10 }
  0x3c   : > { %p18_p2 = scmp.ge.s32.totalorder %s21_s14, 4   ;;  %s804_s10 = smov %s622_s11 }
  0x3d   : > { %s805_s11 = smov %s709_s23  ;;  %s806_s12 = smov %s630_s13 }
  0x3e   : > { %s807_s13 = smov %s809_s17  ;;  %20 = sbr.rel (!%p18_p2) target bundleno = 8 (0x8), region = 94 }
  0x43   :  { %304 = vsyncpa [#allocation3], 1 }
  0x44   :  { %306 = vsyncpa [#allocation3 + $0x1], 1 }
  0x45   :  { %307 = vsyncpa [#allocation6], 1 }
  0x46   :  { %309 = vsyncpa [#allocation6 + $0x1], 1 }
  0x47   :  { %310 = vsyncpa [#allocation4], 1 }
  0x48   :  { %312 = vsyncpa [#allocation4 + $0x1], 1 }

</bundles_post_ra>
